<compile_context>
chip_gen: v7x
topology: tpu7x:2x2x1
jax: 0.10.0
libtpu: 0.0.40
codegen_flags: <defaults>
</compile_context>

<pallas_src>
import jax
import jax.numpy as jnp
from jax.experimental import pallas as pl
from jax.experimental.pallas import tpu as pltpu

HIDDEN = 30
MAX_ACTION_NUM = 10  # synthetic stand-in for SC_DataGenerator().count


def _mlp_kernel(x_ref, w1_ref, b1_ref, w2_ref, b2_ref, w3_ref, b3_ref, out_ref):
    # x_ref: (1, TB)   w1: (H,1) b1: (H,1)   w2: (H,H) b2: (H,1)
    # w3: (A,H) b3: (A,1)   out_ref: (A, TB)
    x = x_ref[...]

    # fc1 is a K=1 contraction -> pure VPU broadcast-multiply, no MXU.
    h1 = jnp.maximum(w1_ref[...] * x + b1_ref[...], 0.0)           # (H, TB)

    # fc2 + ReLU (lane-dense MXU matmul, f32 accumulation)
    h2 = jnp.dot(w2_ref[...], h1, preferred_element_type=jnp.float32)
    h2 = jnp.maximum(h2 + b2_ref[...], 0.0)                         # (H, TB)

    # output head (Q-value prediction, no activation)
    q = jnp.dot(w3_ref[...], h2, preferred_element_type=jnp.float32)
    out_ref[...] = (q + b3_ref[...]).astype(out_ref.dtype)          # (A, TB)


def net_forward(x, params):
    """x: (B, 1) float32.
    params: PyTorch-layout weights (out_features, in_features) and
            biases (out_features, 1)."""
    B = x.shape[0]
    w1, b1, w2, b2, w3, b3 = (
        params["w1"], params["b1"], params["w2"],
        params["b2"], params["w3"], params["b3"],
    )
    A = w3.shape[0]

    # Batch tile: lane-aligned (multiple of 128), capped at 512 so per-step
    # VMEM is tiny and DMA/compute pipeline well on all of v5e/v6e/v7x.
    if B > 512:
        TB = 512
    else:
        TB = max(128, ((B + 127) // 128) * 128)
    B_pad = ((B + TB - 1) // TB) * TB
    num_tiles = B_pad // TB

    # Feature-major, lane-dense input: (1, B_pad), zero-padded past B.
    xt = jnp.zeros((1, B_pad), jnp.float32).at[0, :B].set(x[:, 0].astype(jnp.float32))

    const_spec = lambda shape: pl.BlockSpec(shape, lambda i: tuple(0 for _ in shape))

    out_t = pl.pallas_call(
        _mlp_kernel,
        out_shape=jax.ShapeDtypeStruct((A, B_pad), jnp.float32),
        grid=(num_tiles,),
        in_specs=[
            pl.BlockSpec((1, TB), lambda i: (0, i)),     # x tile (lane-dense)
            const_spec(w1.shape), const_spec(b1.shape),  # weights fetched once
            const_spec(w2.shape), const_spec(b2.shape),
            const_spec(w3.shape), const_spec(b3.shape),
        ],
        out_specs=pl.BlockSpec((A, TB), lambda i: (0, i)),
        compiler_params=pltpu.CompilerParams(
            dimension_semantics=("parallel",),
        ),
    )(xt, w1, b1, w2, b2, w3, b3)

    # Back to PyTorch batch-major (B, A); drop the lane padding.
    return out_t[:, :B].T


def init_params(key):
    """Deterministic init mimicking nn.Linear's U(-1/sqrt(fan_in), 1/sqrt(fan_in)).
    Weights stored as (out_features, in_features); biases as (out_features, 1)."""
    ks = jax.random.split(key, 6)

    def linear(kw, kb, fan_in, fan_out):
        bound = 1.0 / jnp.sqrt(fan_in)
        w = jax.random.uniform(kw, (fan_out, fan_in), jnp.float32, -bound, bound)
        b = jax.random.uniform(kb, (fan_out, 1), jnp.float32, -bound, bound)
        return w, b

    w1, b1 = linear(ks[0], ks[1], 1, HIDDEN)
    w2, b2 = linear(ks[2], ks[3], HIDDEN, HIDDEN)
    w3, b3 = linear(ks[4], ks[5], HIDDEN, MAX_ACTION_NUM)
    return {"w1": w1, "b1": b1, "w2": w2, "b2": b2, "w3": w3, "b3": b3}


if __name__ == "__main__":
    key = jax.random.PRNGKey(0)
    k_params, k_x = jax.random.split(key)

    params = init_params(k_params)
    B = 8
    x = jax.random.normal(k_x, (B, 1), dtype=jnp.float32)

    q = net_forward(x, params)
    jax.block_until_ready(q)

    # Pure-JAX reference of the original PyTorch forward (y = x @ W.T + b).
    def ref(x, p):
        h = jnp.maximum(x @ p["w1"].T + p["b1"].T, 0.0)
        h = jnp.maximum(h @ p["w2"].T + p["b2"].T, 0.0)
        return h @ p["w3"].T + p["b3"].T

    expected = ref(x, params)
    assert q.shape == (B, MAX_ACTION_NUM)
    assert jnp.allclose(q, expected, atol=1e-5, rtol=1e-5)

    # Also exercise a multi-tile batch to check the grid path.
    B2 = 1000
    x2 = jax.random.normal(jax.random.PRNGKey(1), (B2, 1), dtype=jnp.float32)
    q2 = net_forward(x2, params)
    jax.block_until_ready(q2)
    assert q2.shape == (B2, MAX_ACTION_NUM)
    assert jnp.allclose(q2, ref(x2, params), atol=1e-5, rtol=1e-5)

    print("KERNEL_OK")
</pallas_src>

<mosaic_0001>
module attributes {stable_mosaic.version = 11 : i64} {
  func.func @_mlp_kernel(%arg0: i32, %arg1: memref<1x128xf32, #tpu.memory_space<vmem>>, %arg2: memref<30x1xf32, #tpu.memory_space<vmem>>, %arg3: memref<30x1xf32, #tpu.memory_space<vmem>>, %arg4: memref<30x30xf32, #tpu.memory_space<vmem>>, %arg5: memref<30x1xf32, #tpu.memory_space<vmem>>, %arg6: memref<10x30xf32, #tpu.memory_space<vmem>>, %arg7: memref<10x1xf32, #tpu.memory_space<vmem>>, %arg8: memref<10x128xf32, #tpu.memory_space<vmem>>) attributes {dimension_semantics = [#tpu.dimension_semantics<parallel>], iteration_bounds = array<i64: 1>, scalar_prefetch = 0 : i64, scratch_operands = 0 : i64, tpu.core_type = #tpu.core_type<tc>, window_params = [{transform_indices = @transform_0, window_bounds = array<i64: 1, 128>}, {pipeline_mode = #tpu.pipeline_mode<synchronous>, transform_indices = @transform_1, window_bounds = array<i64: 30, 1>}, {pipeline_mode = #tpu.pipeline_mode<synchronous>, transform_indices = @transform_2, window_bounds = array<i64: 30, 1>}, {pipeline_mode = #tpu.pipeline_mode<synchronous>, transform_indices = @transform_3, window_bounds = array<i64: 30, 30>}, {pipeline_mode = #tpu.pipeline_mode<synchronous>, transform_indices = @transform_4, window_bounds = array<i64: 30, 1>}, {pipeline_mode = #tpu.pipeline_mode<synchronous>, transform_indices = @transform_5, window_bounds = array<i64: 10, 30>}, {pipeline_mode = #tpu.pipeline_mode<synchronous>, transform_indices = @transform_6, window_bounds = array<i64: 10, 1>}, {transform_indices = @transform_7, window_bounds = array<i64: 10, 128>}]} {
    %c0 = arith.constant 0 : index
    %c0_0 = arith.constant 0 : index
    %0 = vector.load %arg1[%c0, %c0_0] : memref<1x128xf32, #tpu.memory_space<vmem>>, vector<1x128xf32>
    %c0_1 = arith.constant 0 : index
    %c0_2 = arith.constant 0 : index
    %1 = vector.load %arg2[%c0_1, %c0_2] : memref<30x1xf32, #tpu.memory_space<vmem>>, vector<30x1xf32>
    %2 = vector.broadcast %1 : vector<30x1xf32> to vector<30x128xf32>
    %3 = vector.broadcast %0 : vector<1x128xf32> to vector<30x128xf32>
    %4 = arith.mulf %2, %3 : vector<30x128xf32>
    %c0_3 = arith.constant 0 : index
    %c0_4 = arith.constant 0 : index
    %5 = vector.load %arg3[%c0_3, %c0_4] : memref<30x1xf32, #tpu.memory_space<vmem>>, vector<30x1xf32>
    %6 = vector.broadcast %5 : vector<30x1xf32> to vector<30x128xf32>
    %7 = arith.addf %4, %6 : vector<30x128xf32>
    %cst = arith.constant 0.000000e+00 : f32
    %8 = vector.broadcast %cst : f32 to vector<30x128xf32>
    %9 = arith.maximumf %7, %8 : vector<30x128xf32>
    %c0_5 = arith.constant 0 : index
    %c0_6 = arith.constant 0 : index
    %10 = vector.load %arg4[%c0_5, %c0_6] : memref<30x30xf32, #tpu.memory_space<vmem>>, vector<30x30xf32>
    %cst_7 = arith.constant dense<0.000000e+00> : vector<30x128xf32>
    %11 = tpu.matmul %10, %9, %cst_7 {dimension_numbers = #tpu.dot_dimension_numbers<[1], [0], [0], [1], [0, 0, 1, 1], [], []>} : vector<30x30xf32>, vector<30x128xf32>, vector<30x128xf32> -> vector<30x128xf32>
    %c0_8 = arith.constant 0 : index
    %c0_9 = arith.constant 0 : index
    %12 = vector.load %arg5[%c0_8, %c0_9] : memref<30x1xf32, #tpu.memory_space<vmem>>, vector<30x1xf32>
    %13 = vector.broadcast %12 : vector<30x1xf32> to vector<30x128xf32>
    %14 = arith.addf %11, %13 : vector<30x128xf32>
    %cst_10 = arith.constant 0.000000e+00 : f32
    %15 = vector.broadcast %cst_10 : f32 to vector<30x128xf32>
    %16 = arith.maximumf %14, %15 : vector<30x128xf32>
    %c0_11 = arith.constant 0 : index
    %c0_12 = arith.constant 0 : index
    %17 = vector.load %arg6[%c0_11, %c0_12] : memref<10x30xf32, #tpu.memory_space<vmem>>, vector<10x30xf32>
    %cst_13 = arith.constant dense<0.000000e+00> : vector<10x128xf32>
    %18 = tpu.matmul %17, %16, %cst_13 {dimension_numbers = #tpu.dot_dimension_numbers<[1], [0], [0], [1], [0, 0, 1, 1], [], []>} : vector<10x30xf32>, vector<30x128xf32>, vector<10x128xf32> -> vector<10x128xf32>
    %c0_14 = arith.constant 0 : index
    %c0_15 = arith.constant 0 : index
    %19 = vector.load %arg7[%c0_14, %c0_15] : memref<10x1xf32, #tpu.memory_space<vmem>>, vector<10x1xf32>
    %20 = vector.broadcast %19 : vector<10x1xf32> to vector<10x128xf32>
    %21 = arith.addf %18, %20 : vector<10x128xf32>
    %c0_16 = arith.constant 0 : index
    %c0_17 = arith.constant 0 : index
    %22 = vector.load %arg8[%c0_16, %c0_17] : memref<10x128xf32, #tpu.memory_space<vmem>>, vector<10x128xf32>
    tpu.vector_store %arg8[%c0_16, %c0_17], %21 {strides = array<i32>} : memref<10x128xf32, #tpu.memory_space<vmem>>, vector<10x128xf32>,
    return
  }
  func.func @transform_0(%arg0: i32) -> (i32, i32) {
    %c0_i32 = arith.constant 0 : i32
    %c0_i32_0 = arith.constant 0 : i32
    return %c0_i32, %arg0 : i32, i32
  }
  func.func @transform_1(%arg0: i32) -> (i32, i32) {
    %c0_i32 = arith.constant 0 : i32
    %c0_i32_0 = arith.constant 0 : i32
    %c0_i32_1 = arith.constant 0 : i32
    return %c0_i32, %c0_i32_0 : i32, i32
  }
  func.func @transform_2(%arg0: i32) -> (i32, i32) {
    %c0_i32 = arith.constant 0 : i32
    %c0_i32_0 = arith.constant 0 : i32
    %c0_i32_1 = arith.constant 0 : i32
    return %c0_i32, %c0_i32_0 : i32, i32
  }
  func.func @transform_3(%arg0: i32) -> (i32, i32) {
    %c0_i32 = arith.constant 0 : i32
    %c0_i32_0 = arith.constant 0 : i32
    %c0_i32_1 = arith.constant 0 : i32
    return %c0_i32, %c0_i32_0 : i32, i32
  }
  func.func @transform_4(%arg0: i32) -> (i32, i32) {
    %c0_i32 = arith.constant 0 : i32
    %c0_i32_0 = arith.constant 0 : i32
    %c0_i32_1 = arith.constant 0 : i32
    return %c0_i32, %c0_i32_0 : i32, i32
  }
  func.func @transform_5(%arg0: i32) -> (i32, i32) {
    %c0_i32 = arith.constant 0 : i32
    %c0_i32_0 = arith.constant 0 : i32
    %c0_i32_1 = arith.constant 0 : i32
    return %c0_i32, %c0_i32_0 : i32, i32
  }
  func.func @transform_6(%arg0: i32) -> (i32, i32) {
    %c0_i32 = arith.constant 0 : i32
    %c0_i32_0 = arith.constant 0 : i32
    %c0_i32_1 = arith.constant 0 : i32
    return %c0_i32, %c0_i32_0 : i32, i32
  }
  func.func @transform_7(%arg0: i32) -> (i32, i32) {
    %c0_i32 = arith.constant 0 : i32
    %c0_i32_0 = arith.constant 0 : i32
    return %c0_i32, %arg0 : i32, i32
  }
}

</mosaic_0001>

<bundles_post_ra>
// kernel: tpu_custom_call.1
= control target key start
LH: loop header
LB: loop body
LE: loop exit
PB: predicated region body
PF: predicated region fallthrough
CT: control target
= control target key end

     0   :  { %v443_v2 = vmov 0   ;;  %s581_s0 = inlined_call_operand.vmem [shape: f32[1,128], index: 0, kind: input, shape index: {}]   ;;  %s582_s1 = inlined_call_operand.vmem [shape: f32[30,1], index: 1, kind: input, shape index: {}]   ;;  %s583_s2 = inlined_call_operand.vmem [shape: f32[30,1], index: 2, kind: input, shape index: {}]   ;;  %s584_s3 = inlined_call_operand.vmem [shape: f32[30,30], index: 3, kind: input, shape index: {}]   ;;  %s585_s4 = inlined_call_operand.vmem [shape: f32[30,1], index: 4, kind: input, shape index: {}]   ;;  %s586_s5 = inlined_call_operand.vmem [shape: f32[10,30], index: 5, kind: input, shape index: {}]   ;;  %s587_s6 = inlined_call_operand.vmem [shape: f32[10,1], index: 6, kind: input, shape index: {}]   ;;  %s588_s7 = inlined_call_operand.hbm [shape: f32[10,128], index: 7, kind: output, shape index: {}]  }
   0x1   :  { %v62_v0 = vld [vmem:[%s583_s2] sm:$0xff]  ;;  %418 = vset.pattern.permute.xlu1 %v443_v2  ;;  %417 = vset.pattern.permute.xlu0 %v443_v2  ;;  %v63_v3 = vld [vmem:[%s583_s2 + $0x8] sm:$0xff] }
   0x2   :  { %v28_v1 = vld [vmem:[%s582_s1] sm:$0xff]  ;;  %68 = vperm.xlu1 %418, %v62_v0   ;;  %v29_v4 = vld [vmem:[%s582_s1 + $0x8] sm:$0xff] }
   0x3   :  { %34 = vperm.xlu0 %417, %v28_v1  }
   0x4   :  { %12 = vsyncpa [#allocation3], 0  ;;  %v31_v5 = vld [vmem:[%s582_s1 + $0x18] sm:$0x3f]  ;;  %v30_v6 = vld [vmem:[%s582_s1 + $0x10] sm:$0xff]  ;;  %vm122_vm0 = vcmask 244736  }
   0x5   :  { %v65_v7 = vld [vmem:[%s583_s2 + $0x18] sm:$0x3f]  ;;  %v64_v8 = vld [vmem:[%s583_s2 + $0x10] sm:$0xff]  ;;  %v99_v9 = vld [vmem:[%s585_s4 + $0x8] sm:$0xff]  ;;  %vm135_vm1 = vcmask 1045504   ;;  %vm444_vm2 = vmmov 1  }
   0x6   :  { %73 = vperm.xlu1 %418, %v63_v3   ;;  %v98_v10 = vld [vmem:[%s585_s4] sm:$0xff]  ;;  %v101_v11 = vld [vmem:[%s585_s4 + $0x18] sm:$0x3f]  ;;  %v100_v12 = vld [vmem:[%s585_s4 + $0x10] sm:$0xff]  ;;  %s445_s14 = smov [#allocation2]  }
   0x7   :  { %39 = vperm.xlu0 %417, %v29_v4   ;;  %v94_v13 = vld [vmem:[%s584_s3] sm:$0xff]  ;;  %v231_v14 = vld [vmem:[%s587_s6 + $0x8] sm:$0x3]  ;;  %vm537_vm3 = vmpackc.low %vm135_vm1, %vm444_vm2  ;;  %s333_s15 = sshll.u32 %s445_s14, 4  ;;  %s334_s15 = int_to_ptr.vmem [resolvable:$true] %s333_s15 }
   0x8   :  { %v230_v15 = vld [vmem:[%s587_s6] sm:$0xff]  ;;  %375 = vmatprep.mubr.msk.f32.mxu0 %vm122_vm0, %v94_v13  ;;  %v95_v40 = vld [vmem:[%s584_s3 + $0x8] sm:$0xff]  ;;  %v96_v41 = vld [vmem:[%s584_s3 + $0x10] sm:$0xff]  ;;  %s419_s16 = scalar_lea.vmem %s334_s15, 256  ;;  %p424_p1 = scmp.lt.s32.totalorder %s334_s15, %s334_s15 }
   0x9   :  { %v344_v16 = vld [vmem:[%s581_s0] ss:$0 sm:$0xff]  ;;  %v97_v42 = vld [vmem:[%s584_s3 + $0x18] sm:$0x3f]  ;;  %v229_v62 = vld [vmem:[%s586_s5 + $0x8] sm:$0x3]  ;;  %p420_p0 = scmp.ne.s32.totalorder %s334_s15, %s419_s16  ;;  %p425_p2 = scmp.lt.s32.totalorder %s419_s16, %s419_s16 }
   0xa   :  { %49 = vperm.xlu1 %418, %v31_v5   ;;  %v228_v43 = vld [vmem:[%s586_s5] sm:$0xff] }
   0xb   :  { %44 = vperm.xlu0 %417, %v30_v6   ;;  %389 = vmatprep.mubr.msk.f32.mxu1 %vm122_vm0, %v228_v43  ;;  %p426_p3 = por %p425_p2, %p424_p1 }
   0xd   :  { %p427_p4 = pnand %p426_p3, %p420_p0 }
   0xe   :  { %83 = vperm.xlu1 %418, %v65_v7  }
   0xf   :  { %78 = vperm.xlu0 %417, %v64_v8  }
  0x12   :  { %109 = vperm.xlu1 %418, %v99_v9  }
  0x13   :  { %104 = vperm.xlu0 %417, %v98_v10  }
  0x16   :  { %119 = vperm.xlu1 %418, %v101_v11  }
  0x17   :  { %114 = vperm.xlu0 %417, %v100_v12  }
  0x1a   :  { %239 = vperm.xlu1 %418, %v231_v14  }
  0x1b   :  { %234 = vperm.xlu0 %417, %v230_v15  }
  0x81   :  { %v69_v17 = vpop.permute.xlu1 %68 }
  0x82   :  { %v35_v18 = vpop.permute.xlu0 %34 }
  0x83   :  { %v58_v19 = vmul.f32 %v344_v16, %v35_v18 }
  0x85   :  { %v74_v20 = vpop.permute.xlu1 %73  ;;  %v86_v22 = vadd.f32 %v69_v17, %v58_v19 }
  0x86   :  { %v40_v21 = vpop.permute.xlu0 %39 }
  0x87   :  { %v59_v23 = vmul.f32 %v344_v16, %v40_v21  ;;  %v90_v27 = vmax.f32 %v86_v22, 0.0 }
  0x89   :  { %v87_v24 = vadd.f32 %v74_v20, %v59_v23  ;;  %v50_v25 = vpop.permute.xlu1 %49 }
  0x8a   :  { %v45_v26 = vpop.permute.xlu0 %44  ;;  %v61_v29 = vmul.f32 %v344_v16, %v50_v25 }
  0x8b   :  { %v91_v28 = vmax.f32 %v87_v24, 0.0  ;;  %v60_v30 = vmul.f32 %v344_v16, %v45_v26 }
  0x8d   :  { %v392_v31 = vpack.c.bf16 %v91_v28, %v90_v27  ;;  %v84_v32 = vpop.permute.xlu1 %83 }
  0x8e   :  { %v79_v33 = vpop.permute.xlu0 %78  ;;  %v89_v34 = vadd.f32 %v84_v32, %v61_v29 }
  0x8f   :  { %v88_v35 = vadd.f32 %v79_v33, %v60_v30  ;;  %393 = vmatprep.subr.bf16.mxu0 %v392_v31 }
  0x90   :  { %395 = vmatpush3.bf16.msra.mxu0 %v392_v31  ;;  %v93_v36 = vmax.f32 %v89_v34, 0.0 }
  0x91   :  { %v92_v37 = vmax.f32 %v88_v35, 0.0  ;;  %v110_v44 = vpop.permute.xlu1 %109 }
  0x92   :  { %v105_v45 = vpop.permute.xlu0 %104 }
  0x93   :  { %v396_v39 = vpack.c.bf16 %v93_v36, %v92_v37 }
  0x95   :  { %398 = vmatprep.subr.msk.bf16.mxu0 %vm537_vm3, %v396_v39  ;;  %v120_v51 = vpop.permute.xlu1 %119 }
  0x96   :  { %401 = vmatpush3.bf16.msk.msra.mxu0 %vm537_vm3, %v396_v39  ;;  %v115_v54 = vpop.permute.xlu0 %114 }
  0x99   :  { %376 = vmatmul.mubr.msk.f32.vlgmr.msra.gmra.mrb[0].mxu0 %vm122_vm0, %v95_v40  ;;  %v240_v63 = vpop.permute.xlu1 %239 }
  0x9a   :  { %378 = vmatprep.mubr.msk.f32.mxu0 %vm122_vm0, %v96_v41  ;;  %v235_v1 = vpop.permute.xlu0 %234 }
  0x9d   :  { %379 = vmatmul.mubr.msk.f32.gmra.mrb[2].mxu0 %vm122_vm0, %v97_v42 }
 0x16c   :  { %v377_v46 = vpop.f32.mrb[0].mxu0 }
 0x16d   :  { %v211_v47 = vadd.f32 %v377_v46, %v110_v44  ;;  %v205_v48 = vpop.f32.mrb[1].mxu0 }
 0x16e   :  { %v206_v49 = vadd.f32 %v205_v48, %v105_v45 }
 0x16f   :  { %v225_v50 = vmax.f32 %v211_v47, 0.0 }
 0x170   :  { %v224_v52 = vmax.f32 %v206_v49, 0.0  ;;  %v380_v53 = vpop.f32.mrb[2].mxu0 }
 0x171   :  { %v221_v55 = vadd.f32 %v380_v53, %v120_v51  ;;  %v215_v56 = vpop.f32.mrb[3].mxu0 }
 0x172   :  { %v216_v57 = vadd.f32 %v215_v56, %v115_v54  ;;  %v402_v58 = vpack.c.bf16 %v225_v50, %v224_v52 }
 0x173   :  { %v227_v59 = vmax.f32 %v221_v55, 0.0 }
 0x174   :  { %v226_v60 = vmax.f32 %v216_v57, 0.0  ;;  %403 = vmatprep.subr.bf16.mxu1 %v402_v58 }
 0x175   :  { %405 = vmatpush3.bf16.msra.mxu1 %v402_v58 }
 0x176   :  { %v406_v61 = vpack.c.bf16 %v227_v59, %v226_v60 }
 0x178   :  { %408 = vmatprep.subr.msk.bf16.mxu1 %vm537_vm3, %v406_v61 }
 0x179   :  { %411 = vmatpush3.bf16.msk.msra.mxu1 %vm537_vm3, %v406_v61 }
 0x17c   :  { %390 = vmatmul.mubr.msk.f32.vlgmr.msra.gmra.mrb[0].mxu1 %vm122_vm0, %v229_v62 }
 0x24f   :  { %v391_v0 = vpop.f32.mrb[0].mxu1 }
 0x250   :  { %v323_v2 = vadd.f32 %v391_v0, %v240_v63  ;;  %v317_v3 = vpop.f32.mrb[1].mxu1 }
 0x251   :  { %v318_v4 = vadd.f32 %v317_v3, %v235_v1 }
 0x252   :  { %327 = vst [vmem:[#allocation2 + $0x8] sm:$0x3] %v323_v2 }
 0x253   :  { %326 = vst [vmem:[#allocation2] sm:$0xff] %v318_v4 }
 0x254   :  { %430 = shalt.err (!%p427_p4)
}
 0x255   :  { %s431_s18 = scalar_lea.hbm %s588_s7, 256 }
 0x256   :  { %p432_p5 = scmp.ne.s32.totalorder %s588_s7, %s431_s18  ;;  %p435_p6 = scmp.lt.u32.totalorder %s431_s18, %s588_s7 }
 0x258   :  { %p437_p7 = pnand %p435_p6, %p432_p5 }
 0x25a   :  { %440 = shalt.err (!%p437_p7)
}
 0x25b   :  { %s446_s22 = smov 128   ;;  %s447_s23 = smov 8  }
 0x25c   :  { %339 = dma.vmem_to_hbm [thread:$0]  %s334_s15, 256, %s588_s7, [#allocation3], %s446_s22, %s446_s22, %s447_s23  }
 0x25d   :  { %441 = dma.done.wait [#allocation3], 256  }
 0x25e   :  { %442 = vsyncadd [#allocation3], 4294967040 }
 0x25f   :  { %343 = vsyncpa [#allocation3], 1 }

</bundles_post_ra>
